<compile_context>
chip_gen: v6e
topology: v6e:2x2x1
jax: 0.10.0
libtpu: 0.0.40
codegen_flags: <defaults>
</compile_context>

<pallas_src>
import functools

import jax
import jax.numpy as jnp
from jax import lax
from jax.experimental import pallas as pl
from jax.experimental.pallas import tpu as pltpu

# Module hyper-parameters (from __init__ defaults).
TEMPERATURE = 0.1
SIM_THRESHOLD = 0.15
DISSIM_THRESHOLD = 0.35
CLIP_LOGITS = 30.0

_SENTINEL = 2 ** 30  # larger than any valid column index


def _theta_d2max_kernel(thq_ref, thk_ref, sqq_ref, sqk_ref, out_ref, *, n, tr, tc):
    """Running max of pairwise squared theta distances over a (row, col) tiled grid."""
    i = pl.program_id(0)
    j = pl.program_id(1)

    @pl.when((i == 0) & (j == 0))
    def _init():
        out_ref[...] = jnp.zeros_like(out_ref)

    d2 = sqq_ref[...] + sqk_ref[...] - 2.0 * lax.dot_general(
        thq_ref[...], thk_ref[...], (((1,), (1,)), ((), ())),
        preferred_element_type=jnp.float32)

    # Mask ragged edges (static at trace time; skipped when tiles divide N).
    if n % tc != 0:
        col_g = j * tc + lax.broadcasted_iota(jnp.int32, (1, tc), 1)
        d2 = jnp.where(col_g < n, d2, 0.0)
    if n % tr != 0:
        row_g = i * tr + lax.broadcasted_iota(jnp.int32, (tr, 1), 0)
        d2 = jnp.where(row_g < n, d2, 0.0)

    blk_max = jnp.max(jnp.max(d2, axis=-1, keepdims=True), axis=0, keepdims=True)
    out_ref[...] = jnp.maximum(out_ref[...], blk_max)


def _ntxent_loss_kernel(thr_ref,                      # SMEM (1,2): scaled squared thresholds
                        eq_ref, ek_ref,               # (TR,D), (TC,D) embeddings
                        thq_ref, thk_ref,             # (TR,T), (TC,T) thetas (f32)
                        sqq_ref, sqk_ref,             # (TR,1), (1,TC) theta squared norms
                        loss_ref, valid_ref,          # outputs (TR,1), (TR,1)
                        sumexp_acc, firstpos_acc, target_acc, hasneg_acc,  # VMEM scratch
                        *, n, tr, tc):
    i = pl.program_id(0)
    j = pl.program_id(1)
    nj = pl.num_programs(1)
    neg_inf = jnp.float32(-jnp.inf)

    @pl.when(j == 0)
    def _init():
        sumexp_acc[...] = jnp.zeros_like(sumexp_acc)
        firstpos_acc[...] = jnp.full(firstpos_acc.shape, _SENTINEL, jnp.int32)
        target_acc[...] = jnp.zeros_like(target_acc)
        hasneg_acc[...] = jnp.zeros_like(hasneg_acc)

    # --- F.normalize(embeddings, dim=-1) on the row / column tiles ---
    eq = eq_ref[...].astype(jnp.float32)
    eq = eq * lax.rsqrt(jnp.maximum(jnp.sum(eq * eq, axis=-1, keepdims=True), 1e-24))
    ek = ek_ref[...].astype(jnp.float32)
    ek = ek * lax.rsqrt(jnp.maximum(jnp.sum(ek * ek, axis=-1, keepdims=True), 1e-24))

    # --- similarity logits: bf16 MXU inputs, f32 accumulate, clipped, diag -> -inf ---
    sim = lax.dot_general(eq.astype(jnp.bfloat16), ek.astype(jnp.bfloat16),
                          (((1,), (1,)), ((), ())),
                          preferred_element_type=jnp.float32) * (1.0 / TEMPERATURE)
    sim = jnp.clip(sim, -CLIP_LOGITS, CLIP_LOGITS)

    row_g = i * tr + lax.broadcasted_iota(jnp.int32, (tr, 1), 0)
    col_g = j * tc + lax.broadcasted_iota(jnp.int32, (1, tc), 1)
    sim = jnp.where(row_g == col_g, neg_inf, sim)

    # --- squared theta distances (f32) vs pre-scaled squared thresholds (no sqrt/div) ---
    d2 = sqq_ref[...] + sqk_ref[...] - 2.0 * lax.dot_general(
        thq_ref[...], thk_ref[...], (((1,), (1,)), ((), ())),
        preferred_element_type=jnp.float32)
    pos = d2 < thr_ref[0, 0]
    neg = d2 > thr_ref[0, 1]
    if n % tc != 0:  # mask ragged column edge (static at trace time)
        cvalid = col_g < n
        pos = pos & cvalid
        neg = neg & cvalid
    sel = pos | neg

    # --- running sum of exp(logit - clip) over selected columns (fixed LSE bound) ---
    p = jnp.where(sel, jnp.exp(sim - CLIP_LOGITS), 0.0)
    sumexp_acc[...] += jnp.sum(p, axis=-1, keepdims=True)

    # --- running "row has a negative" flag (pos is never empty: diagonal dist is 0) ---
    hasneg_acc[...] = jnp.maximum(
        hasneg_acc[...],
        jnp.max(jnp.where(neg, 1.0, 0.0), axis=-1, keepdims=True))

    # --- running (first positive index, logit at that index) ---
    blk_first = jnp.min(jnp.where(pos, col_g, _SENTINEL), axis=-1, keepdims=True)
    blk_target = jnp.sum(jnp.where(col_g == blk_first, sim, 0.0),
                         axis=-1, keepdims=True)
    upd = blk_first < firstpos_acc[...]
    target_acc[...] = jnp.where(upd, blk_target, target_acc[...])
    firstpos_acc[...] = jnp.where(upd, blk_first, firstpos_acc[...])

    @pl.when(j == nj - 1)
    def _finalize():
        lse = CLIP_LOGITS + jnp.log(sumexp_acc[...])
        valid = hasneg_acc[...] > 0.0
        loss_ref[...] = jnp.where(valid, lse - target_acc[...], 0.0)
        valid_ref[...] = hasneg_acc[...]


def _block_sizes(n):
    tr = n if n <= 256 else 256        # row tile: multiple of 8 (or full)
    tc = n if n <= 512 else 512        # col tile: multiple of 128 (or full)
    return tr, tc


def ntxent_theta_contrastive_loss(embeddings, thetas):
    """embeddings: (N, D), thetas: (N, T) -> scalar loss (float32)."""
    n, d = embeddings.shape
    t = thetas.shape[-1]
    tr, tc = _block_sizes(n)
    n_r = pl.cdiv(n, tr)
    n_c = pl.cdiv(n, tc)

    th32 = thetas.astype(jnp.float32)
    sq = jnp.sum(th32 * th32, axis=-1)
    sq_col = sq.reshape(n, 1)      # for row blocks   (N, 1)
    sq_row = sq.reshape(1, n)      # for column blocks (1, N)

    vmem_limit = 32 * 1024 * 1024

    # ---- pre-pass: global max pairwise squared theta distance ----
    d2max = pl.pallas_call(
        functools.partial(_theta_d2max_kernel, n=n, tr=tr, tc=tc),
        out_shape=jax.ShapeDtypeStruct((1, 1), jnp.float32),
        grid_spec=pltpu.PrefetchScalarGridSpec(
            num_scalar_prefetch=0,
            grid=(n_r, n_c),
            in_specs=[
                pl.BlockSpec((tr, t), lambda i, j: (i, 0)),
                pl.BlockSpec((tc, t), lambda i, j: (j, 0)),
                pl.BlockSpec((tr, 1), lambda i, j: (i, 0)),
                pl.BlockSpec((1, tc), lambda i, j: (0, j)),
            ],
            out_specs=pl.BlockSpec((1, 1), lambda i, j: (0, 0)),
        ),
        compiler_params=pltpu.CompilerParams(
            dimension_semantics=("arbitrary", "arbitrary"),
            vmem_limit_bytes=vmem_limit),
    )(th32, th32, sq_col, sq_row)

    # Fold the /(dmax + 1e-8) normalization into squared thresholds (scalar math).
    dmax = jnp.sqrt(jnp.maximum(d2max[0, 0], 0.0))
    scale = dmax + 1e-8
    thr2 = jnp.stack([(SIM_THRESHOLD * scale) ** 2,
                      (DISSIM_THRESHOLD * scale) ** 2]).reshape(1, 2).astype(jnp.float32)

    # ---- main flash-style pass ----
    loss_rows, valid_rows = pl.pallas_call(
        functools.partial(_ntxent_loss_kernel, n=n, tr=tr, tc=tc),
        out_shape=(jax.ShapeDtypeStruct((n, 1), jnp.float32),
                   jax.ShapeDtypeStruct((n, 1), jnp.float32)),
        grid_spec=pltpu.PrefetchScalarGridSpec(
            num_scalar_prefetch=0,
            grid=(n_r, n_c),
            in_specs=[
                pl.BlockSpec(memory_space=pltpu.MemorySpace.SMEM),   # thresholds (1,2)
                pl.BlockSpec((tr, d), lambda i, j: (i, 0)),          # row embeddings
                pl.BlockSpec((tc, d), lambda i, j: (j, 0)),          # col embeddings
                pl.BlockSpec((tr, t), lambda i, j: (i, 0)),          # row thetas
                pl.BlockSpec((tc, t), lambda i, j: (j, 0)),          # col thetas
                pl.BlockSpec((tr, 1), lambda i, j: (i, 0)),          # row theta sq-norms
                pl.BlockSpec((1, tc), lambda i, j: (0, j)),          # col theta sq-norms
            ],
            out_specs=[pl.BlockSpec((tr, 1), lambda i, j: (i, 0)),
                       pl.BlockSpec((tr, 1), lambda i, j: (i, 0))],
            scratch_shapes=[
                pltpu.VMEM((tr, 1), jnp.float32),   # running sum-exp
                pltpu.VMEM((tr, 1), jnp.int32),     # running first-positive index
                pltpu.VMEM((tr, 1), jnp.float32),   # logit at first positive
                pltpu.VMEM((tr, 1), jnp.float32),   # has-negative flag
            ],
        ),
        compiler_params=pltpu.CompilerParams(
            dimension_semantics=("parallel", "arbitrary"),
            vmem_limit_bytes=vmem_limit),
    )(thr2, embeddings, embeddings, th32, th32, sq_col, sq_row)

    # Tiny final reduction over per-row results (kept out of the kernel so the row
    # axis stays megacore-parallel without cross-core accumulation).
    total = jnp.sum(loss_rows)
    cnt = jnp.sum(valid_rows)
    return jnp.where(cnt > 0.0, total / jnp.maximum(cnt, 1.0), 0.0)


def _reference(embeddings, thetas):
    """Pure-JAX mirror of the PyTorch forward (vectorized; same semantics)."""
    e = embeddings / jnp.maximum(
        jnp.linalg.norm(embeddings, axis=-1, keepdims=True), 1e-12)
    n = e.shape[0]
    sim = jnp.clip(e @ e.T / TEMPERATURE, -CLIP_LOGITS, CLIP_LOGITS)
    sim = jnp.where(jnp.eye(n, dtype=bool), -jnp.inf, sim)
    dist = jnp.sqrt(jnp.maximum(
        jnp.sum((thetas[:, None, :] - thetas[None, :, :]) ** 2, axis=-1), 0.0))
    dist = dist / (dist.max() + 1e-8)
    pos = dist < SIM_THRESHOLD
    neg = dist > DISSIM_THRESHOLD
    col = jnp.broadcast_to(jnp.arange(n)[None, :], (n, n))
    first_pos = jnp.min(jnp.where(pos, col, n), axis=-1)
    target = sim[jnp.arange(n), first_pos]
    vals = jnp.where(pos | neg, sim, -jnp.inf)
    m = jnp.maximum(jnp.max(vals, axis=-1), -CLIP_LOGITS)
    lse = m + jnp.log(jnp.sum(jnp.exp(vals - m[:, None]), axis=-1))
    valid = pos.any(-1) & neg.any(-1)
    loss_i = jnp.where(valid, lse - target, 0.0)
    cnt = valid.sum()
    return jnp.where(cnt > 0, loss_i.sum() / jnp.maximum(cnt, 1), 0.0)


if __name__ == "__main__":
    key = jax.random.PRNGKey(0)
    k_emb, k_th = jax.random.split(key)
    N, D, T = 8, 32, 4
    embeddings = jax.random.normal(k_emb, (N, D), dtype=jnp.float32)
    thetas = jax.random.uniform(k_th, (N, T), dtype=jnp.float32)

    loss = jax.jit(ntxent_theta_contrastive_loss)(embeddings, thetas)
    loss = jax.block_until_ready(loss)

    ref = _reference(embeddings, thetas)
    same_inf = bool(jnp.isinf(loss)) and bool(jnp.isinf(ref))
    ok = same_inf or bool(jnp.allclose(loss, ref, rtol=2e-2, atol=1e-3))
    assert ok, (loss, ref)
    print("KERNEL_OK")
</pallas_src>

<mosaic_0001>
module attributes {stable_mosaic.version = 11 : i64} {
  func.func @_theta_d2max_kernel(%arg0: i32, %arg1: i32, %arg2: memref<8x4xf32, #tpu.memory_space<vmem>>, %arg3: memref<8x4xf32, #tpu.memory_space<vmem>>, %arg4: memref<8x1xf32, #tpu.memory_space<vmem>>, %arg5: memref<1x8xf32, #tpu.memory_space<vmem>>, %arg6: memref<1x1xf32, #tpu.memory_space<vmem>>) attributes {dimension_semantics = [#tpu.dimension_semantics<arbitrary>, #tpu.dimension_semantics<arbitrary>], iteration_bounds = array<i64: 1, 1>, scalar_prefetch = 0 : i64, scratch_operands = 0 : i64, tpu.core_type = #tpu.core_type<tc>, window_params = [{transform_indices = @transform_0, window_bounds = array<i64: 8, 4>}, {transform_indices = @transform_1, window_bounds = array<i64: 8, 4>}, {transform_indices = @transform_2, window_bounds = array<i64: 8, 1>}, {transform_indices = @transform_3, window_bounds = array<i64: 1, 8>}, {pipeline_mode = #tpu.pipeline_mode<synchronous>, transform_indices = @transform_4, window_bounds = array<i64: 1, 1>}]} {
    %c0_i32 = arith.constant 0 : i32
    %0 = arith.cmpi eq, %arg0, %c0_i32 : i32
    %c0_i32_0 = arith.constant 0 : i32
    %1 = arith.cmpi eq, %arg1, %c0_i32_0 : i32
    %2 = arith.andi %0, %1 : i1
    %3 = arith.extui %2 : i1 to i32
    %c0_i32_1 = arith.constant 0 : i32
    %4 = arith.cmpi ne, %3, %c0_i32_1 : i32
    scf.if %4 {
      %cst_16 = arith.constant 0.000000e+00 : f32
      %23 = vector.broadcast %cst_16 : f32 to vector<1x1xf32>
      %c0_17 = arith.constant 0 : index
      %c0_18 = arith.constant 0 : index
      %24 = vector.load %arg6[%c0_17, %c0_18] : memref<1x1xf32, #tpu.memory_space<vmem>>, vector<1x1xf32>
      tpu.vector_store %arg6[%c0_17, %c0_18], %23 {strides = array<i32>} : memref<1x1xf32, #tpu.memory_space<vmem>>, vector<1x1xf32>,
    } else {
    }
    %c0 = arith.constant 0 : index
    %c0_2 = arith.constant 0 : index
    %5 = vector.load %arg4[%c0, %c0_2] : memref<8x1xf32, #tpu.memory_space<vmem>>, vector<8x1xf32>
    %c0_3 = arith.constant 0 : index
    %c0_4 = arith.constant 0 : index
    %6 = vector.load %arg5[%c0_3, %c0_4] : memref<1x8xf32, #tpu.memory_space<vmem>>, vector<1x8xf32>
    %7 = vector.broadcast %5 : vector<8x1xf32> to vector<8x8xf32>
    %8 = vector.broadcast %6 : vector<1x8xf32> to vector<8x8xf32>
    %9 = arith.addf %7, %8 : vector<8x8xf32>
    %c0_5 = arith.constant 0 : index
    %c0_6 = arith.constant 0 : index
    %10 = vector.load %arg2[%c0_5, %c0_6] : memref<8x4xf32, #tpu.memory_space<vmem>>, vector<8x4xf32>
    %c0_7 = arith.constant 0 : index
    %c0_8 = arith.constant 0 : index
    %11 = vector.load %arg3[%c0_7, %c0_8] : memref<8x4xf32, #tpu.memory_space<vmem>>, vector<8x4xf32>
    %cst = arith.constant dense<0.000000e+00> : vector<8x8xf32>
    %12 = tpu.matmul %10, %11, %cst {dimension_numbers = #tpu.dot_dimension_numbers<[1], [1], [0], [0], [0, 0, 1, 0], [], []>} : vector<8x4xf32>, vector<8x4xf32>, vector<8x8xf32> -> vector<8x8xf32>
    %cst_9 = arith.constant 2.000000e+00 : f32
    %13 = vector.broadcast %cst_9 : f32 to vector<8x8xf32>
    %14 = arith.mulf %13, %12 : vector<8x8xf32>
    %15 = arith.subf %9, %14 : vector<8x8xf32>
    %cst_10 = arith.constant dense<0xFF800000> : vector<8xf32>
    %16 = vector.multi_reduction <maximumf>, %15, %cst_10 [1] : vector<8x8xf32> to vector<8xf32>
    %17 = vector.shape_cast %16 : vector<8xf32> to vector<8x1xf32>
    %cst_11 = arith.constant dense<0xFF800000> : vector<1xf32>
    %18 = vector.multi_reduction <maximumf>, %17, %cst_11 [0] : vector<8x1xf32> to vector<1xf32>
    %19 = vector.shape_cast %18 : vector<1xf32> to vector<1x1xf32>
    %c0_12 = arith.constant 0 : index
    %c0_13 = arith.constant 0 : index
    %20 = vector.load %arg6[%c0_12, %c0_13] : memref<1x1xf32, #tpu.memory_space<vmem>>, vector<1x1xf32>
    %21 = arith.maximumf %20, %19 : vector<1x1xf32>
    %c0_14 = arith.constant 0 : index
    %c0_15 = arith.constant 0 : index
    %22 = vector.load %arg6[%c0_14, %c0_15] : memref<1x1xf32, #tpu.memory_space<vmem>>, vector<1x1xf32>
    tpu.vector_store %arg6[%c0_14, %c0_15], %21 {strides = array<i32>} : memref<1x1xf32, #tpu.memory_space<vmem>>, vector<1x1xf32>,
    return
  }
  func.func @transform_0(%arg0: i32, %arg1: i32) -> (i32, i32) {
    %c0_i32 = arith.constant 0 : i32
    %c0_i32_0 = arith.constant 0 : i32
    return %arg0, %c0_i32 : i32, i32
  }
  func.func @transform_1(%arg0: i32, %arg1: i32) -> (i32, i32) {
    %c0_i32 = arith.constant 0 : i32
    %c0_i32_0 = arith.constant 0 : i32
    return %arg1, %c0_i32 : i32, i32
  }
  func.func @transform_2(%arg0: i32, %arg1: i32) -> (i32, i32) {
    %c0_i32 = arith.constant 0 : i32
    %c0_i32_0 = arith.constant 0 : i32
    return %arg0, %c0_i32 : i32, i32
  }
  func.func @transform_3(%arg0: i32, %arg1: i32) -> (i32, i32) {
    %c0_i32 = arith.constant 0 : i32
    %c0_i32_0 = arith.constant 0 : i32
    return %c0_i32, %arg1 : i32, i32
  }
  func.func @transform_4(%arg0: i32, %arg1: i32) -> (i32, i32) {
    %c0_i32 = arith.constant 0 : i32
    %c0_i32_0 = arith.constant 0 : i32
    %c0_i32_1 = arith.constant 0 : i32
    return %c0_i32, %c0_i32_0 : i32, i32
  }
}

module attributes {stable_mosaic.version = 11 : i64} {
  func.func @_ntxent_loss_kernel(%arg0: i32, %arg1: i32, %arg2: memref<1x2xf32, #tpu.memory_space<smem>>, %arg3: memref<8x32xf32, #tpu.memory_space<vmem>>, %arg4: memref<8x32xf32, #tpu.memory_space<vmem>>, %arg5: memref<8x4xf32, #tpu.memory_space<vmem>>, %arg6: memref<8x4xf32, #tpu.memory_space<vmem>>, %arg7: memref<8x1xf32, #tpu.memory_space<vmem>>, %arg8: memref<1x8xf32, #tpu.memory_space<vmem>>, %arg9: memref<8x1xf32, #tpu.memory_space<vmem>>, %arg10: memref<8x1xf32, #tpu.memory_space<vmem>>, %arg11: memref<8x1xf32, #tpu.memory_space<vmem>>, %arg12: memref<8x1xi32, #tpu.memory_space<vmem>>, %arg13: memref<8x1xf32, #tpu.memory_space<vmem>>, %arg14: memref<8x1xf32, #tpu.memory_space<vmem>>) attributes {dimension_semantics = [#tpu.dimension_semantics<parallel>, #tpu.dimension_semantics<arbitrary>], iteration_bounds = array<i64: 1, 1>, scalar_prefetch = 0 : i64, scratch_operands = 4 : i64, tpu.core_type = #tpu.core_type<tc>, window_params = [{transform_indices = @transform_0, window_bounds = array<i64: 1, 2>}, {transform_indices = @transform_1, window_bounds = array<i64: 8, 32>}, {transform_indices = @transform_2, window_bounds = array<i64: 8, 32>}, {transform_indices = @transform_3, window_bounds = array<i64: 8, 4>}, {transform_indices = @transform_4, window_bounds = array<i64: 8, 4>}, {transform_indices = @transform_5, window_bounds = array<i64: 8, 1>}, {transform_indices = @transform_6, window_bounds = array<i64: 1, 8>}, {transform_indices = @transform_7, window_bounds = array<i64: 8, 1>}, {transform_indices = @transform_8, window_bounds = array<i64: 8, 1>}]} {
    %c0_i32 = arith.constant 0 : i32
    %0 = arith.cmpi eq, %arg1, %c0_i32 : i32
    %1 = arith.extui %0 : i1 to i32
    %c0_i32_0 = arith.constant 0 : i32
    %2 = arith.cmpi ne, %1, %c0_i32_0 : i32
    scf.if %2 {
      %cst_55 = arith.constant 0.000000e+00 : f32
      %103 = vector.broadcast %cst_55 : f32 to vector<8x1xf32>
      %c0_56 = arith.constant 0 : index
      %c0_57 = arith.constant 0 : index
      %104 = vector.load %arg11[%c0_56, %c0_57] : memref<8x1xf32, #tpu.memory_space<vmem>>, vector<8x1xf32>
      tpu.vector_store %arg11[%c0_56, %c0_57], %103 {strides = array<i32>} : memref<8x1xf32, #tpu.memory_space<vmem>>, vector<8x1xf32>,
      %c1073741824_i32_58 = arith.constant 1073741824 : i32
      %105 = vector.broadcast %c1073741824_i32_58 : i32 to vector<8x1xi32>
      %c0_59 = arith.constant 0 : index
      %c0_60 = arith.constant 0 : index
      %106 = vector.load %arg12[%c0_59, %c0_60] : memref<8x1xi32, #tpu.memory_space<vmem>>, vector<8x1xi32>
      tpu.vector_store %arg12[%c0_59, %c0_60], %105 {strides = array<i32>} : memref<8x1xi32, #tpu.memory_space<vmem>>, vector<8x1xi32>,
      %cst_61 = arith.constant 0.000000e+00 : f32
      %107 = vector.broadcast %cst_61 : f32 to vector<8x1xf32>
      %c0_62 = arith.constant 0 : index
      %c0_63 = arith.constant 0 : index
      %108 = vector.load %arg13[%c0_62, %c0_63] : memref<8x1xf32, #tpu.memory_space<vmem>>, vector<8x1xf32>
      tpu.vector_store %arg13[%c0_62, %c0_63], %107 {strides = array<i32>} : memref<8x1xf32, #tpu.memory_space<vmem>>, vector<8x1xf32>,
      %cst_64 = arith.constant 0.000000e+00 : f32
      %109 = vector.broadcast %cst_64 : f32 to vector<8x1xf32>
      %c0_65 = arith.constant 0 : index
      %c0_66 = arith.constant 0 : index
      %110 = vector.load %arg14[%c0_65, %c0_66] : memref<8x1xf32, #tpu.memory_space<vmem>>, vector<8x1xf32>
      tpu.vector_store %arg14[%c0_65, %c0_66], %109 {strides = array<i32>} : memref<8x1xf32, #tpu.memory_space<vmem>>, vector<8x1xf32>,
    } else {
    }
    %c0 = arith.constant 0 : index
    %c0_1 = arith.constant 0 : index
    %3 = vector.load %arg3[%c0, %c0_1] : memref<8x32xf32, #tpu.memory_space<vmem>>, vector<8x32xf32>
    %4 = arith.mulf %3, %3 : vector<8x32xf32>
    %cst = arith.constant dense<0.000000e+00> : vector<8xf32>
    %5 = vector.multi_reduction <add>, %4, %cst [1] : vector<8x32xf32> to vector<8xf32>
    %6 = vector.shape_cast %5 : vector<8xf32> to vector<8x1xf32>
    %cst_2 = arith.constant 1.000000e-24 : f32
    %7 = vector.broadcast %cst_2 : f32 to vector<8x1xf32>
    %8 = arith.maximumf %6, %7 : vector<8x1xf32>
    %9 = math.rsqrt %8 : vector<8x1xf32>
    %10 = vector.broadcast %9 : vector<8x1xf32> to vector<8x32xf32>
    %11 = arith.mulf %3, %10 : vector<8x32xf32>
    %c0_3 = arith.constant 0 : index
    %c0_4 = arith.constant 0 : index
    %12 = vector.load %arg4[%c0_3, %c0_4] : memref<8x32xf32, #tpu.memory_space<vmem>>, vector<8x32xf32>
    %13 = arith.mulf %12, %12 : vector<8x32xf32>
    %cst_5 = arith.constant dense<0.000000e+00> : vector<8xf32>
    %14 = vector.multi_reduction <add>, %13, %cst_5 [1] : vector<8x32xf32> to vector<8xf32>
    %15 = vector.shape_cast %14 : vector<8xf32> to vector<8x1xf32>
    %cst_6 = arith.constant 1.000000e-24 : f32
    %16 = vector.broadcast %cst_6 : f32 to vector<8x1xf32>
    %17 = arith.maximumf %15, %16 : vector<8x1xf32>
    %18 = math.rsqrt %17 : vector<8x1xf32>
    %19 = vector.broadcast %18 : vector<8x1xf32> to vector<8x32xf32>
    %20 = arith.mulf %12, %19 : vector<8x32xf32>
    %21 = arith.truncf %11 : vector<8x32xf32> to vector<8x32xbf16>
    %22 = arith.truncf %20 : vector<8x32xf32> to vector<8x32xbf16>
    %cst_7 = arith.constant dense<0.000000e+00> : vector<8x8xf32>
    %23 = tpu.matmul %21, %22, %cst_7 {dimension_numbers = #tpu.dot_dimension_numbers<[1], [1], [0], [0], [0, 0, 1, 0], [], []>} : vector<8x32xbf16>, vector<8x32xbf16>, vector<8x8xf32> -> vector<8x8xf32>
    %cst_8 = arith.constant 1.000000e+01 : f32
    %24 = vector.broadcast %cst_8 : f32 to vector<8x8xf32>
    %25 = arith.mulf %23, %24 : vector<8x8xf32>
    %cst_9 = arith.constant -3.000000e+01 : f32
    %cst_10 = arith.constant 3.000000e+01 : f32
    %26 = vector.broadcast %cst_9 : f32 to vector<8x8xf32>
    %27 = arith.maximumf %26, %25 : vector<8x8xf32>
    %28 = vector.broadcast %cst_10 : f32 to vector<8x8xf32>
    %29 = arith.minimumf %28, %27 : vector<8x8xf32>
    %c8_i32 = arith.constant 8 : i32
    %30 = arith.muli %arg0, %c8_i32 : i32
    %31 = tpu.iota {dimensions = array<i32: 0>} : vector<8x1xi32>
    %32 = vector.broadcast %30 : i32 to vector<8x1xi32>
    %33 = arith.addi %32, %31 : vector<8x1xi32>
    %c8_i32_11 = arith.constant 8 : i32
    %34 = arith.muli %arg1, %c8_i32_11 : i32
    %35 = tpu.iota {dimensions = array<i32: 1>} : vector<1x8xi32>
    %36 = vector.broadcast %34 : i32 to vector<1x8xi32>
    %37 = arith.addi %36, %35 : vector<1x8xi32>
    %38 = vector.broadcast %33 : vector<8x1xi32> to vector<8x8xi32>
    %39 = vector.broadcast %37 : vector<1x8xi32> to vector<8x8xi32>
    %40 = arith.cmpi eq, %38, %39 : vector<8x8xi32>
    %cst_12 = arith.constant 0xFF800000 : f32
    %41 = vector.broadcast %cst_12 : f32 to vector<8x8xf32>
    %42 = arith.select %40, %41, %29 : vector<8x8xi1>, vector<8x8xf32>
    %c0_13 = arith.constant 0 : index
    %c0_14 = arith.constant 0 : index
    %43 = vector.load %arg7[%c0_13, %c0_14] : memref<8x1xf32, #tpu.memory_space<vmem>>, vector<8x1xf32>
    %c0_15 = arith.constant 0 : index
    %c0_16 = arith.constant 0 : index
    %44 = vector.load %arg8[%c0_15, %c0_16] : memref<1x8xf32, #tpu.memory_space<vmem>>, vector<1x8xf32>
    %45 = vector.broadcast %43 : vector<8x1xf32> to vector<8x8xf32>
    %46 = vector.broadcast %44 : vector<1x8xf32> to vector<8x8xf32>
    %47 = arith.addf %45, %46 : vector<8x8xf32>
    %c0_17 = arith.constant 0 : index
    %c0_18 = arith.constant 0 : index
    %48 = vector.load %arg5[%c0_17, %c0_18] : memref<8x4xf32, #tpu.memory_space<vmem>>, vector<8x4xf32>
    %c0_19 = arith.constant 0 : index
    %c0_20 = arith.constant 0 : index
    %49 = vector.load %arg6[%c0_19, %c0_20] : memref<8x4xf32, #tpu.memory_space<vmem>>, vector<8x4xf32>
    %cst_21 = arith.constant dense<0.000000e+00> : vector<8x8xf32>
    %50 = tpu.matmul %48, %49, %cst_21 {dimension_numbers = #tpu.dot_dimension_numbers<[1], [1], [0], [0], [0, 0, 1, 0], [], []>} : vector<8x4xf32>, vector<8x4xf32>, vector<8x8xf32> -> vector<8x8xf32>
    %cst_22 = arith.constant 2.000000e+00 : f32
    %51 = vector.broadcast %cst_22 : f32 to vector<8x8xf32>
    %52 = arith.mulf %51, %50 : vector<8x8xf32>
    %53 = arith.subf %47, %52 : vector<8x8xf32>
    %c0_23 = arith.constant 0 : index
    %c0_24 = arith.constant 0 : index
    %54 = memref.load %arg2[%c0_23, %c0_24] : memref<1x2xf32, #tpu.memory_space<smem>>
    %55 = vector.broadcast %54 : f32 to vector<8x8xf32>
    %56 = arith.cmpf olt, %53, %55 : vector<8x8xf32>
    %c0_25 = arith.constant 0 : index
    %c1 = arith.constant 1 : index
    %57 = memref.load %arg2[%c0_25, %c1] : memref<1x2xf32, #tpu.memory_space<smem>>
    %58 = vector.broadcast %57 : f32 to vector<8x8xf32>
    %59 = arith.cmpf ogt, %53, %58 : vector<8x8xf32>
    %60 = arith.ori %56, %59 : vector<8x8xi1>
    %cst_26 = arith.constant 3.000000e+01 : f32
    %61 = vector.broadcast %cst_26 : f32 to vector<8x8xf32>
    %62 = arith.subf %42, %61 : vector<8x8xf32>
    %63 = math.exp %62 : vector<8x8xf32>
    %cst_27 = arith.constant 0.000000e+00 : f32
    %64 = vector.broadcast %cst_27 : f32 to vector<8x8xf32>
    %65 = arith.select %60, %63, %64 : vector<8x8xi1>, vector<8x8xf32>
    %c0_28 = arith.constant 0 : index
    %c0_29 = arith.constant 0 : index
    %66 = vector.load %arg11[%c0_28, %c0_29] : memref<8x1xf32, #tpu.memory_space<vmem>>, vector<8x1xf32>
    %cst_30 = arith.constant dense<0.000000e+00> : vector<8xf32>
    %67 = vector.multi_reduction <add>, %65, %cst_30 [1] : vector<8x8xf32> to vector<8xf32>
    %68 = vector.shape_cast %67 : vector<8xf32> to vector<8x1xf32>
    %69 = arith.addf %66, %68 : vector<8x1xf32>
    %c0_31 = arith.constant 0 : index
    %c0_32 = arith.constant 0 : index
    %70 = vector.load %arg11[%c0_31, %c0_32] : memref<8x1xf32, #tpu.memory_space<vmem>>, vector<8x1xf32>
    tpu.vector_store %arg11[%c0_31, %c0_32], %69 {strides = array<i32>} : memref<8x1xf32, #tpu.memory_space<vmem>>, vector<8x1xf32>,
    %c0_33 = arith.constant 0 : index
    %c0_34 = arith.constant 0 : index
    %71 = vector.load %arg14[%c0_33, %c0_34] : memref<8x1xf32, #tpu.memory_space<vmem>>, vector<8x1xf32>
    %cst_35 = arith.constant 1.000000e+00 : f32
    %cst_36 = arith.constant 0.000000e+00 : f32
    %72 = vector.broadcast %cst_35 : f32 to vector<8x8xf32>
    %73 = vector.broadcast %cst_36 : f32 to vector<8x8xf32>
    %74 = arith.select %59, %72, %73 : vector<8x8xi1>, vector<8x8xf32>
    %cst_37 = arith.constant dense<0xFF800000> : vector<8xf32>
    %75 = vector.multi_reduction <maximumf>, %74, %cst_37 [1] : vector<8x8xf32> to vector<8xf32>
    %76 = vector.shape_cast %75 : vector<8xf32> to vector<8x1xf32>
    %77 = arith.maximumf %71, %76 : vector<8x1xf32>
    %c0_38 = arith.constant 0 : index
    %c0_39 = arith.constant 0 : index
    %78 = vector.load %arg14[%c0_38, %c0_39] : memref<8x1xf32, #tpu.memory_space<vmem>>, vector<8x1xf32>
    tpu.vector_store %arg14[%c0_38, %c0_39], %77 {strides = array<i32>} : memref<8x1xf32, #tpu.memory_space<vmem>>, vector<8x1xf32>,
    %c1073741824_i32 = arith.constant 1073741824 : i32
    %79 = vector.shape_cast %37 : vector<1x8xi32> to vector<1x8xi32>
    %80 = vector.broadcast %79 : vector<1x8xi32> to vector<8x8xi32>
    %81 = vector.broadcast %c1073741824_i32 : i32 to vector<8x8xi32>
    %82 = arith.select %56, %80, %81 : vector<8x8xi1>, vector<8x8xi32>
    %cst_40 = arith.constant dense<2147483647> : vector<8xi32>
    %83 = vector.multi_reduction <minsi>, %82, %cst_40 [1] : vector<8x8xi32> to vector<8xi32>
    %84 = vector.shape_cast %83 : vector<8xi32> to vector<8x1xi32>
    %85 = vector.broadcast %37 : vector<1x8xi32> to vector<8x8xi32>
    %86 = vector.broadcast %84 : vector<8x1xi32> to vector<8x8xi32>
    %87 = arith.cmpi eq, %85, %86 : vector<8x8xi32>
    %cst_41 = arith.constant 0.000000e+00 : f32
    %88 = vector.broadcast %cst_41 : f32 to vector<8x8xf32>
    %89 = arith.select %87, %42, %88 : vector<8x8xi1>, vector<8x8xf32>
    %cst_42 = arith.constant dense<0.000000e+00> : vector<8xf32>
    %90 = vector.multi_reduction <add>, %89, %cst_42 [1] : vector<8x8xf32> to vector<8xf32>
    %91 = vector.shape_cast %90 : vector<8xf32> to vector<8x1xf32>
    %c0_43 = arith.constant 0 : index
    %c0_44 = arith.constant 0 : index
    %92 = vector.load %arg12[%c0_43, %c0_44] : memref<8x1xi32, #tpu.memory_space<vmem>>, vector<8x1xi32>
    %93 = arith.cmpi slt, %84, %92 : vector<8x1xi32>
    %c0_45 = arith.constant 0 : index
    %c0_46 = arith.constant 0 : index
    %94 = vector.load %arg13[%c0_45, %c0_46] : memref<8x1xf32, #tpu.memory_space<vmem>>, vector<8x1xf32>
    %95 = arith.select %93, %91, %94 : vector<8x1xi1>, vector<8x1xf32>
    %c0_47 = arith.constant 0 : index
    %c0_48 = arith.constant 0 : index
    %96 = vector.load %arg13[%c0_47, %c0_48] : memref<8x1xf32, #tpu.memory_space<vmem>>, vector<8x1xf32>
    tpu.vector_store %arg13[%c0_47, %c0_48], %95 {strides = array<i32>} : memref<8x1xf32, #tpu.memory_space<vmem>>, vector<8x1xf32>,
    %c0_49 = arith.constant 0 : index
    %c0_50 = arith.constant 0 : index
    %97 = vector.load %arg12[%c0_49, %c0_50] : memref<8x1xi32, #tpu.memory_space<vmem>>, vector<8x1xi32>
    %98 = arith.select %93, %84, %97 : vector<8x1xi1>, vector<8x1xi32>
    %c0_51 = arith.constant 0 : index
    %c0_52 = arith.constant 0 : index
    %99 = vector.load %arg12[%c0_51, %c0_52] : memref<8x1xi32, #tpu.memory_space<vmem>>, vector<8x1xi32>
    tpu.vector_store %arg12[%c0_51, %c0_52], %98 {strides = array<i32>} : memref<8x1xi32, #tpu.memory_space<vmem>>, vector<8x1xi32>,
    %c0_i32_53 = arith.constant 0 : i32
    %100 = arith.cmpi eq, %arg1, %c0_i32_53 : i32
    %101 = arith.extui %100 : i1 to i32
    %c0_i32_54 = arith.constant 0 : i32
    %102 = arith.cmpi ne, %101, %c0_i32_54 : i32
    scf.if %102 {
      %c0_55 = arith.constant 0 : index
      %c0_56 = arith.constant 0 : index
      %103 = vector.load %arg11[%c0_55, %c0_56] : memref<8x1xf32, #tpu.memory_space<vmem>>, vector<8x1xf32>
      %104 = math.log %103 : vector<8x1xf32>
      %cst_57 = arith.constant 3.000000e+01 : f32
      %105 = vector.broadcast %cst_57 : f32 to vector<8x1xf32>
      %106 = arith.addf %105, %104 : vector<8x1xf32>
      %c0_58 = arith.constant 0 : index
      %c0_59 = arith.constant 0 : index
      %107 = vector.load %arg14[%c0_58, %c0_59] : memref<8x1xf32, #tpu.memory_space<vmem>>, vector<8x1xf32>
      %cst_60 = arith.constant 0.000000e+00 : f32
      %108 = vector.broadcast %cst_60 : f32 to vector<8x1xf32>
      %109 = arith.cmpf ogt, %107, %108 : vector<8x1xf32>
      %c0_61 = arith.constant 0 : index
      %c0_62 = arith.constant 0 : index
      %110 = vector.load %arg13[%c0_61, %c0_62] : memref<8x1xf32, #tpu.memory_space<vmem>>, vector<8x1xf32>
      %111 = arith.subf %106, %110 : vector<8x1xf32>
      %cst_63 = arith.constant 0.000000e+00 : f32
      %112 = vector.broadcast %cst_63 : f32 to vector<8x1xf32>
      %113 = arith.select %109, %111, %112 : vector<8x1xi1>, vector<8x1xf32>
      %c0_64 = arith.constant 0 : index
      %c0_65 = arith.constant 0 : index
      %114 = vector.load %arg9[%c0_64, %c0_65] : memref<8x1xf32, #tpu.memory_space<vmem>>, vector<8x1xf32>
      tpu.vector_store %arg9[%c0_64, %c0_65], %113 {strides = array<i32>} : memref<8x1xf32, #tpu.memory_space<vmem>>, vector<8x1xf32>,
      %c0_66 = arith.constant 0 : index
      %c0_67 = arith.constant 0 : index
      %115 = vector.load %arg14[%c0_66, %c0_67] : memref<8x1xf32, #tpu.memory_space<vmem>>, vector<8x1xf32>
      %c0_68 = arith.constant 0 : index
      %c0_69 = arith.constant 0 : index
      %116 = vector.load %arg10[%c0_68, %c0_69] : memref<8x1xf32, #tpu.memory_space<vmem>>, vector<8x1xf32>
      tpu.vector_store %arg10[%c0_68, %c0_69], %115 {strides = array<i32>} : memref<8x1xf32, #tpu.memory_space<vmem>>, vector<8x1xf32>,
    } else {
    }
    return
  }
  func.func @transform_0(%arg0: i32, %arg1: i32) -> (i32, i32) {
    %c0_i32 = arith.constant 0 : i32
    %c0_i32_0 = arith.constant 0 : i32
    %c0_i32_1 = arith.constant 0 : i32
    return %c0_i32, %c0_i32_0 : i32, i32
  }
  func.func @transform_1(%arg0: i32, %arg1: i32) -> (i32, i32) {
    %c0_i32 = arith.constant 0 : i32
    %c0_i32_0 = arith.constant 0 : i32
    return %arg0, %c0_i32 : i32, i32
  }
  func.func @transform_2(%arg0: i32, %arg1: i32) -> (i32, i32) {
    %c0_i32 = arith.constant 0 : i32
    %c0_i32_0 = arith.constant 0 : i32
    return %arg1, %c0_i32 : i32, i32
  }
  func.func @transform_3(%arg0: i32, %arg1: i32) -> (i32, i32) {
    %c0_i32 = arith.constant 0 : i32
    %c0_i32_0 = arith.constant 0 : i32
    return %arg0, %c0_i32 : i32, i32
  }
  func.func @transform_4(%arg0: i32, %arg1: i32) -> (i32, i32) {
    %c0_i32 = arith.constant 0 : i32
    %c0_i32_0 = arith.constant 0 : i32
    return %arg1, %c0_i32 : i32, i32
  }
  func.func @transform_5(%arg0: i32, %arg1: i32) -> (i32, i32) {
    %c0_i32 = arith.constant 0 : i32
    %c0_i32_0 = arith.constant 0 : i32
    return %arg0, %c0_i32 : i32, i32
  }
  func.func @transform_6(%arg0: i32, %arg1: i32) -> (i32, i32) {
    %c0_i32 = arith.constant 0 : i32
    %c0_i32_0 = arith.constant 0 : i32
    return %c0_i32, %arg1 : i32, i32
  }
  func.func @transform_7(%arg0: i32, %arg1: i32) -> (i32, i32) {
    %c0_i32 = arith.constant 0 : i32
    %c0_i32_0 = arith.constant 0 : i32
    return %arg0, %c0_i32 : i32, i32
  }
  func.func @transform_8(%arg0: i32, %arg1: i32) -> (i32, i32) {
    %c0_i32 = arith.constant 0 : i32
    %c0_i32_0 = arith.constant 0 : i32
    return %arg0, %c0_i32 : i32, i32
  }
}

</mosaic_0001>

<bundles_post_ra>
// kernel: ntxent_theta_contrastive_loss.2
= control target key start
LH: loop header
LB: loop body
LE: loop exit
PB: predicated region body
PF: predicated region fallthrough
CT: control target
= control target key end

     0   :  { %vm24_vm0 = vcmask 0   ;;  %vm42_vm1 = vcmask 31744   ;;  %v186_v1 = vmov 0.0   ;;  %vm187_vm2 = vmmov 0   ;;  %s232_s0 = inlined_call_operand.vmem [shape: f32[8,4], index: 0, kind: input, shape index: {}, may-alias: {0,1}]   ;;  %s233_s1 = inlined_call_operand.vmem [shape: f32[8,4], index: 1, kind: input, shape index: {}, may-alias: {0,1}]   ;;  %s234_s2 = inlined_call_operand.vmem [shape: f32[8,1], index: 2, kind: input, shape index: {}]   ;;  %s235_s3 = inlined_call_operand.vmem [shape: f32[1,8], index: 3, kind: input, shape index: {}]   ;;  %s236_s4 = inlined_call_operand.hbm [shape: f32[1,1], index: 4, kind: output, shape index: {}]  }
   0x1   :  { %v41_v0 = vld [vmem:[%s233_s1] sm:$0xff]  ;;  %25 = vst.msk [vmem:[#allocation2] sm:$0x1] %vm24_vm0, %v186_v1  ;;  %154 = vmatprep.subr.mxu0 %v186_v1  ;;  %156 = vmatprep.mubr.msk.f32.mxu0 %vm187_vm2, %v186_v1 }
   0x2   :  { %v26_v2 = vld [vmem:[%s234_s2] sm:$0xff] }
   0x3   :  { %9 = vsyncpa [#allocation3], 0  ;;  %155 = vmatpush3.xpose.msk.msra.mxu0 %vm42_vm1, %v41_v0  ;;  %v40_v3 = vld [vmem:[%s232_s0] sm:$0xff]  ;;  %v188_v4 = vmov 0   ;;  %vm121_vm3 = vcmask 64512   ;;  %s189_s0 = smov [#allocation2]  }
   0x4   :  { %163 = vset.pattern.permute.xlu0 %v188_v4  ;;  %v149_v5 = vld [vmem:[%s235_s3] ss:$0 sm:$0xff]  ;;  %s141_s2 = sshll.u32 %s189_s0, 4  ;;  %s142_s2 = int_to_ptr.vmem [resolvable:$true] %s141_s2 }
   0x5   :  { %30 = vperm.xlu0 %163, %v26_v2   ;;  %s164_s3 = scalar_lea.vmem %s142_s2, 16  ;;  %s168_s22 = scalar_lea.vmem %s142_s2, 32 }
   0x6   :  { %157 = vmatmul.mubr.msk.f32.vlgmr.msra.gmra.mxu0 %vm42_vm1, %v40_v3  ;;  %p165_p0 = scmp.ne.s32.totalorder %s142_s2, %s164_s3  ;;  %p169_p1 = scmp.lt.s32.totalorder %s142_s2, %s142_s2 }
   0x7   :  { %p170_p2 = scmp.lt.s32.totalorder %s168_s22, %s164_s3 }
   0x8   :  { %v131_v19 = vld [vmem:[#allocation2] sm:$0x1] }
   0x9   :  { %p171_p3 = por %p170_p2, %p169_p1 }
   0xb   :  { %p172_p4 = pnand %p171_p3, %p165_p0 }
  0x80   :  { %v31_v6 = vpop.permute.xlu0 %30 }
  0x81   :  { %v39_v7 = vadd.f32 %v149_v5, %v31_v6 }
  0xc6   :  { %v115_v8 = vpop.f32.mrf.mxu0 }
  0xc7   :  { %v119_v9 = vmul.f32 2.0, %v115_v8 }
  0xc8   :  { %v158_v10 = vpop.f32.mrf.mxu0 }
  0xc9   :  { %v120_v11 = vsub.f32 %v39_v7, %v119_v9 }
  0xcb   :  { %v122_v12 = vsel %vm121_vm3, %v120_v11, -inf }
  0xcc   :  { %123 = vmax.xlane.f32.xlu0 %v122_v12 }
 0x155   :  { %v124_v13 = vpop.xlane.xlu0 %123 }
 0x156   :  { %v125_v14 = vrot.slane %v124_v13, 4 }
 0x158   :  { %v126_v15 = vmax.f32 %v124_v13, %v125_v14 }
 0x15a   :  { %v127_v16 = vrot.slane %v126_v15, 2 }
 0x15c   :  { %v128_v17 = vmax.f32 %v126_v15, %v127_v16 }
 0x15e   :  { %v129_v18 = vrot.slane %v128_v17, 1 }
 0x160   :  { %v130_v20 = vmax.f32 %v128_v17, %v129_v18 }
 0x162   :  { %v132_v21 = vmax.f32 %v131_v19, %v130_v20 }
 0x164   :  { %134 = vst.msk [vmem:[#allocation2] sm:$0x1] %vm24_vm0, %v132_v21 }
 0x165   :  { %175 = shalt.err (!%p172_p4)
}
 0x166   :  { %144 = dma.vmem_to_hbm [thread:$0]  %s142_s2, 16, %s236_s4, [#allocation3]  }
 0x167   :  { %184 = dma.done.wait [#allocation3], 16  }
 0x168   :  { %185 = vsyncadd [#allocation3], 4294967280 }
 0x169   :  { %148 = vsyncpa [#allocation3], 1 }

// kernel: ntxent_theta_contrastive_loss.3
= control target key start
LH: loop header
LB: loop body
LE: loop exit
PB: predicated region body
PF: predicated region fallthrough
CT: control target
= control target key end

     0   :  { %14 = vsyncpa [#allocation7], 0  ;;  %s484_s0 = inlined_call_operand.vmem [shape: f32[1,2], index: 0, kind: input, shape index: {}]   ;;  %s485_s1 = inlined_call_operand.vmem [shape: f32[8,32], index: 1, kind: input, shape index: {}, may-alias: {1,2}]   ;;  %s486_s2 = inlined_call_operand.vmem [shape: f32[8,32], index: 2, kind: input, shape index: {}, may-alias: {1,2}]   ;;  %s487_s3 = inlined_call_operand.vmem [shape: f32[8,4], index: 3, kind: input, shape index: {}, may-alias: {3,4}]   ;;  %s488_s4 = inlined_call_operand.vmem [shape: f32[8,4], index: 4, kind: input, shape index: {}, may-alias: {3,4}]   ;;  %s489_s5 = inlined_call_operand.vmem [shape: f32[8,1], index: 5, kind: input, shape index: {}]   ;;  %s490_s6 = inlined_call_operand.vmem [shape: f32[1,8], index: 6, kind: input, shape index: {}]   ;;  %s491_s7 = inlined_call_operand.vmem [shape: f32[8,1], index: 7, kind: output, shape index: {0}]   ;;  %s492_s8 = inlined_call_operand.vmem [shape: f32[8,1], index: 8, kind: output, shape index: {1}]  }
   0x1   :  { %s21_s29 = sshll.u32 %s484_s0, 4  ;;  %s22_s29 = int_to_ptr.vmem [resolvable:$true] %s21_s29 }
   0x2   :  { %s342_s30 = scalar_lea.vmem %s22_s29, 16  ;;  %p347_p1 = scmp.lt.s32.totalorder %s22_s29, %s22_s29 }
   0x3   :  { %p343_p0 = scmp.ne.s32.totalorder %s22_s29, %s342_s30  ;;  %p348_p2 = scmp.lt.s32.totalorder %s342_s30, %s342_s30 }
   0x5   :  { %p349_p3 = por %p348_p2, %p347_p1 }
   0x7   :  { %p350_p4 = pnand %p349_p3, %p343_p0 }
   0x9   :  { %353 = shalt.err (!%p350_p4)
}
   0xa   :  { %s356_s9 = smov [#allocation6]  }
   0xb   :  { %24 = dma.vmem_to_smem %s22_s29, 16, %s356_s9, [#allocation7]  }
   0xc   :  { %354 = dma.done.wait [#allocation7], 16  }
   0xd   :  { %355 = vsyncadd [#allocation7], 4294967280 }
   0xe   :  { %40 = sfence }
   0xf   :  { %v146_v0 = vld [vmem:[%s488_s4] sm:$0xff]  ;;  %vm147_vm0 = vcmask 31744   ;;  %vm53_vm1 = vcmask 261120   ;;  %v357_v2 = vmov 0.0   ;;  %vm358_vm2 = vmmov 0  }
  0x10   :  { %v60_v1 = vld [vmem:[%s486_s2] sm:$0xff]  ;;  %322 = vmatprep.subr.mxu1 %v357_v2  ;;  %324 = vmatprep.mubr.msk.f32.mxu1 %vm358_vm2, %v357_v2  ;;  %v359_v8 = vmov 0   ;;  %s310_s2 = sld [smem:[#allocation6 + $0x1]]  ;;  %v120_v24 = vlaneseq  ;;  %vm238_vm3 = vcmask 64512   ;;  %vm46_vm8 = vcmask 7168  }
  0x11   :  { %v61_v3 = vmul.f32 %v60_v1, %v60_v1  ;;  %v51_v4 = vld [vmem:[%s485_s1] sm:$0xff]  ;;  %323 = vmatpush3.xpose.msk.msra.mxu1 %vm147_vm0, %v146_v0  ;;  %332 = vset.pattern.permute.xlu1 %v359_v8  ;;  %s226_s1 = sld [smem:[#allocation6]]  ;;  %47 = vst.msk [vmem:[#allocation2] sm:$0xff] %vm46_vm8, %v357_v2  ;;  %49 = vst.msk [vmem:[#allocation4] sm:$0xff] %vm46_vm8, %v357_v2  ;;  %v360_v43 = vmov 1073741824  }
  0x12   :  { %v131_v5 = vld [vmem:[%s489_s5] sm:$0xff]  ;;  %v52_v7 = vmul.f32 %v51_v4, %v51_v4  ;;  %316 = vmatprep.subr.bf16.mxu0 %v357_v2  ;;  %318 = vmatprep.mubr.msk.bf16.mxu0 %vm358_vm2, %v357_v2  ;;  %v126_v30 = vand.u32 127, %v120_v24  ;;  %50 = vst.msk [vmem:[#allocation5] sm:$0xff] %vm46_vm8, %v357_v2  ;;  %48 = vst.msk [vmem:[#allocation3] sm:$0xff] %vm46_vm8, %v360_v43  ;;  %v121_v44 = vshrl.u32 %v120_v24, 7 }
  0x13   :  { %v145_v6 = vld [vmem:[%s487_s3] sm:$0xff]  ;;  %v62_v9 = vsel %vm53_vm1, %v61_v3, 0.0  ;;  %135 = vperm.xlu1 %332, %v131_v5   ;;  %333 = vset.pattern.permute.xlu0 %v359_v8 }
  0x14   :  { %63 = vadd.xlane.f32.xlu0 %v62_v9  ;;  %325 = vmatmul.mubr.msk.f32.vlgmr.msra.gmra.mxu1 %vm147_vm0, %v145_v6  ;;  %v54_v10 = vsel %vm53_vm1, %v52_v7, 0.0  ;;  %v307_v22 = vld [vmem:[%s490_s6] ss:$0 sm:$0xff]  ;;  %vm129_vm9 = vcmp.eq.s32.totalorder %v121_v44, %v126_v30 }
  0x16   :  { %v230_v31 = vstv %s310_s2 }
  0x17   :  { %v227_v28 = vstv %s226_s1 }
  0x18   :  { %55 = vadd.xlane.f32.xlu0 %v54_v10 }
  0x19   :  { %v273_v63 = vld [vmem:[#allocation3] sm:$0xff]  ;;  %v245_v7 = vld [vmem:[#allocation5] sm:$0xff] }
  0x8e   :  { %v136_v23 = vpop.permute.xlu1 %135 }
  0x8f   :  { %v144_v25 = vadd.f32 %v307_v22, %v136_v23 }
  0x9d   :  { %v64_v11 = vpop.xlane.xlu0 %63 }
  0x9e   :  { %v65_v12 = vmax.f32 %v64_v11, 1e-24 }
  0xa0   :  { %334 = vrsqrt.f32 %v65_v12  ;;  %v275_v12 = vld [vmem:[#allocation4] sm:$0xff] }
  0xa1   :  { %v56_v13 = vpop.xlane.xlu0 %55 }
  0xa2   :  { %v57_v14 = vmax.f32 %v56_v13, 1e-24 }
  0xa4   :  { %336 = vrsqrt.f32 %v57_v14 }
  0xad   :  { %v335_v15 = vpop.eup %334 }
  0xae   :  { %v67_v16 = vmul.f32 %v335_v15, %v60_v1 }
  0xb0   :  { %v69_v17 = vpack.c.bf16 %v67_v16, %v67_v16 }
  0xb1   :  { %v337_v18 = vpop.eup %336 }
  0xb2   :  { %v74_v19 = vsel %vm53_vm1, %v69_v17, 0  ;;  %v59_v20 = vmul.f32 %v337_v18, %v51_v4 }
  0xb3   :  { %317 = vmatpush3.bf16.xpose.msra.mxu0 %v74_v19 }
  0xb4   :  { %v68_v21 = vpack.c.bf16 %v59_v20, %v59_v20 }
  0xba   :  { %319 = vmatmul.mubr.msk.bf16.vlgmr.msra.gmra.mxu0 %vm53_vm1, %v68_v21 }
  0xd4   :  { %v220_v26 = vpop.f32.mrf.mxu1 }
  0xd5   :  { %v224_v27 = vmul.f32 2.0, %v220_v26 }
  0xd6   :  { %v326_v29 = vpop.f32.mrf.mxu1 }
  0xd7   :  { %v225_v32 = vsub.f32 %v144_v25, %v224_v27 }
  0xd9   :  { %vm437_vm4 = vcmp.lt.f32.partialorder %v225_v32, %v227_v28  ;;  %vm441_vm5 = vcmp.gt.f32.partialorder %v225_v32, %v230_v31 }
  0xda   :  { %v252_v35 = vsel %vm437_vm4, %v126_v30, 1073741824  ;;  %vm232_vm6 = vmor %vm437_vm4, %vm441_vm5  ;;  %v246_v57 = vsel %vm441_vm5, 1.0, %v357_v2  ;;  %v237_v2 = vld [vmem:[#allocation2] sm:$0xff] }
  0xdb   :  { %v253_v36 = vsel %vm238_vm3, %v252_v35, 2147483647  ;;  %v247_v58 = vsel %vm238_vm3, %v246_v57, -inf }
  0xdc   :  { %v255_v37 = vshra.s32 %v253_v36, 16  ;;  %v254_v39 = vand.u32 65535, %v253_v36 }
  0xde   :  { %v257_v38 = vcvt.s32.f32 %v255_v37  ;;  %v256_v41 = vcvt.s32.f32 %v254_v39 }
  0xe0   :  { %258 = vmin.xlane.f32.xlu1 %v257_v38 }
 0x169   :  { %v259_v40 = vpop.xlane.xlu1 %258 }
 0x16a   :  { %vm260_vm7 = vcmp.eq.f32.partialorder %v257_v38, %v259_v40  ;;  %v265_v59 = vcvt.f32.s32 %v259_v40 }
 0x16b   :  { %v261_v42 = vsel %vm260_vm7, %v256_v41, inf }
 0x16c   :  { %262 = vmin.xlane.f32.xlu0 %v261_v42  ;;  %v266_v61 = vshll.u32 %v265_v59, 16 }
 0x17a   :  { %v110_v45 = vpop.f32.mrf.mxu0 }
 0x17b   :  { %v116_v46 = vmul.f32 10.0, %v110_v45 }
 0x17c   :  { %v320_v47 = vpop.f32.mrf.mxu0 }
 0x17d   :  { %v306_v48 = vclamps-f32 %v116_v46, 30.0 }
 0x17e   :  { %v113_v49 = vpop.f32.mrf.mxu0 }
 0x17f   :  { %v130_v50 = vsel %vm129_vm9, -inf, %v306_v48 }
 0x180   :  { %v311_v51 = vadd.f32 -30.0, %v130_v50  ;;  %v321_v52 = vpop.f32.mrf.mxu0 }
 0x182   :  { %v234_v53 = vmul.f32 1.442695, %v311_v51 }
 0x184   :  { %338 = vpow2.f32 %v234_v53 }
 0x191   :  { %v339_v54 = vpop.eup %338 }
 0x192   :  { %v236_v55 = vsel %vm232_vm6, %v339_v54, 0.0 }
 0x193   :  { %v239_v56 = vsel %vm238_vm3, %v236_v55, 0.0 }
 0x194   :  { %240 = vadd.xlane.f32.xlu0 %v239_v56 }
 0x198   :  { %248 = vmax.xlane.f32.xlu0 %v247_v58 }
 0x1f5   :  { %v263_v60 = vpop.xlane.xlu0 %262 }
 0x1f6   :  { %v264_v62 = vcvt.f32.s32 %v263_v60 }
 0x1f8   :  { %v267_v0 = vadd.s32 %v266_v61, %v264_v62 }
 0x1fa   :  { %vm268_vm10 = vcmp.eq.s32.totalorder %v126_v30, %v267_v0  ;;  %vm274_vm11 = vcmp.lt.s32.totalorder %v267_v0, %v273_v63 }
 0x1fb   :  { %v269_v1 = vsel %vm268_vm10, %v130_v50, 0.0  ;;  %v279_v3 = vsel %vm274_vm11, %v267_v0, %v273_v63 }
 0x1fc   :  { %v270_v4 = vsel %vm238_vm3, %v269_v1, 0.0  ;;  %280 = vst.msk [vmem:[#allocation3] sm:$0xff] %vm46_vm8, %v279_v3 }
 0x1fd   :  { %271 = vadd.xlane.f32.xlu0 %v270_v4 }
 0x21d   :  { %v241_v5 = vpop.xlane.xlu0 %240 }
 0x21e   :  { %v242_v6 = vadd.f32 %v241_v5, %v237_v2 }
 0x220   :  { %244 = vst.msk [vmem:[#allocation2] sm:$0xff] %vm46_vm8, %v242_v6 }
 0x221   :  { %v249_v8 = vpop.xlane.xlu0 %248 }
 0x222   :  { %v250_v9 = vmax.f32 %v245_v7, %v249_v8 }
 0x224   :  { %251 = vst.msk [vmem:[#allocation5] sm:$0xff] %vm46_vm8, %v250_v9 }
 0x227   :  { %v284_v11 = vld [vmem:[#allocation2] sm:$0xff] }
 0x228   :  { %340 = vlog2.f32 %v284_v11 }
 0x22b   :  { %v288_v10 = vld [vmem:[#allocation5] sm:$0xff] }
 0x22c   :  { %295 = vst.msk [vmem:[%s492_s8] sm:$0xff] %vm46_vm8, %v288_v10  ;;  %vm289_vm12 = vcmp.gt.f32.partialorder %v288_v10, 0.0 }
 0x235   :  { %v341_v14 = vpop.eup %340 }
 0x236   :  { %v286_v16 = vmul.f32 0.6931472, %v341_v14 }
 0x238   :  { %v287_v17 = vadd.f32 30.0, %v286_v16 }
 0x286   :  { %v272_v13 = vpop.xlane.xlu0 %271 }
 0x287   :  { %v276_v15 = vsel %vm274_vm11, %v272_v13, %v275_v12 }
 0x288   :  { %277 = vst.msk [vmem:[#allocation4] sm:$0xff] %vm46_vm8, %v276_v15 }
 0x28f   :  { %v290_v18 = vld [vmem:[#allocation4] sm:$0xff] }
 0x290   :  { %v291_v19 = vsub.f32 %v287_v17, %v290_v18 }
 0x292   :  { %v292_v20 = vsel %vm289_vm12, %v291_v19, 0.0 }
 0x293   :  { %293 = vst.msk [vmem:[%s491_s7] sm:$0xff] %vm46_vm8, %v292_v20 }
 0x294   :  { %304 = vsyncpa [#allocation7], 1 }

</bundles_post_ra>
